<compile_context>
chip_gen: v5e
topology: v5e:2x2
jax: 0.10.0
libtpu: 0.0.40
codegen_flags: <defaults>
</compile_context>

<pallas_src>
import math

import jax
import jax.numpy as jnp
from jax.experimental import pallas as pl
from jax.experimental.pallas import tpu as pltpu

_LANES = 128
_SUBLANES = 8


def _round_up(x, m):
    return ((x + m - 1) // m) * m


def _pick_pack(h_in, h_out, max_pack=8):
    """Smallest p such that p*h_in and p*h_out are both multiples of 128."""
    p_in = _LANES // math.gcd(h_in, _LANES)
    p_out = _LANES // math.gcd(h_out, _LANES)
    p = (p_in * p_out) // math.gcd(p_in, p_out)
    return p if p <= max_pack else 1


def _linear_kernel(x_ref, w_ref, b_ref, o_ref):
    # x_ref: (tile_p, P*H_in)  w_ref: (P*H_in, P*H_out)  b_ref: (1, P*H_out)
    # o_ref: (tile_p, P*H_out) -- lane-dense (>=128 lanes), unmasked stores.
    acc = jnp.dot(x_ref[...], w_ref[...], preferred_element_type=jnp.float32)
    o_ref[...] = (acc + b_ref[...]).astype(o_ref.dtype)


def make_time_distributed_linear(weight, bias, *, compute_dtype=None,
                                 out_dtype=None, row_tile=4096,
                                 xla_fallback_rows=0):
    """Build a jitted TimeDistributed(nn.Linear) forward.

    weight:        (H_in, H_out)  (transposed vs torch's (H_out, H_in))
    bias:          (H_out,)
    compute_dtype: dtype of the activation/weight HBM traffic (e.g. bf16);
                   pass activations already in this dtype for the full win.
                   MXU accumulation and the bias add stay in f32.
    out_dtype:     output dtype (default: input dtype). bf16 halves the
                   writeback, the largest byte term here.
    row_tile:      (unpacked) rows per grid step.
    xla_fallback_rows: if >0, problems with fewer rows use a plain XLA matmul
                   (one-step grids waste a v7x TensorCore + launch overhead).
    """
    H_in, H_out = weight.shape
    cdt = jnp.dtype(compute_dtype) if compute_dtype is not None else weight.dtype
    pack = _pick_pack(H_in, H_out)

    # Hoisted once-per-module prep (never in the per-call hot path).
    w_cdt = jnp.asarray(weight, cdt)
    bias_f32 = jnp.asarray(bias, jnp.float32)
    wp = jnp.kron(jnp.eye(pack, dtype=cdt), w_cdt)            # (P*H_in, P*H_out)
    bp = jnp.tile(bias_f32, pack).reshape(1, pack * H_out)    # f32 bias

    @jax.jit
    def forward(input_seq):
        assert input_seq.ndim > 2, "TimeDistributed expects (B, T, ...) input"
        B, T = input_seq.shape[0], input_seq.shape[1]
        feat = math.prod(input_seq.shape[2:])
        assert feat == H_in, (feat, H_in)
        N = B * T
        odt = jnp.dtype(out_dtype) if out_dtype is not None else input_seq.dtype

        # TimeDistributed glue: (B, T, *feat) -> (B*T, H_in).
        x2d = input_seq.reshape(N, H_in)
        if x2d.dtype != cdt:
            # Prefer feeding activations already in compute_dtype; if not, this
            # convert is allowed to fuse into the pallas input (see
            # allow_input_fusion) instead of a separate HBM pass.
            x2d = x2d.astype(cdt)

        if xla_fallback_rows and N < xla_fallback_rows:
            y = jnp.dot(x2d, w_cdt, preferred_element_type=jnp.float32) + bias_f32
            return y.astype(odt).reshape((B, T, H_out))

        # Lane-dense row packing. Pad at most (pack-1) rows, never to tile_rows.
        pad_rows = (-N) % pack
        if pad_rows:
            x2d = jnp.pad(x2d, ((0, pad_rows), (0, 0)))
        n_packed = (N + pad_rows) // pack
        xp = x2d.reshape(n_packed, pack * H_in)

        # Row tiling; the ragged final block is handled by Pallas directly
        # (OOB reads discarded, OOB writes dropped) -> no pad / slice pass.
        tile_p_req = max(1, row_tile // pack)
        if n_packed <= tile_p_req:
            tile_p = n_packed                       # single full-extent block
        else:
            tile_p = max(_SUBLANES, (tile_p_req // _SUBLANES) * _SUBLANES)
            steps = pl.cdiv(n_packed, tile_p)
            if steps > 1 and steps % 2:
                # Prefer an even step count so v7x's two TCs get balanced work.
                tile_p = max(_SUBLANES,
                             _round_up(pl.cdiv(n_packed, steps + 1), _SUBLANES))
        grid = (pl.cdiv(n_packed, tile_p),)

        cost = pl.CostEstimate(
            flops=2 * N * H_in * H_out,             # useful flops only
            transcendentals=0,
            bytes_accessed=(N * H_in * cdt.itemsize
                            + wp.size * wp.dtype.itemsize
                            + bp.size * bp.dtype.itemsize
                            + N * H_out * odt.itemsize),
        )

        out_p = pl.pallas_call(
            _linear_kernel,
            out_shape=jax.ShapeDtypeStruct((n_packed, pack * H_out), odt),
            grid_spec=pltpu.PrefetchScalarGridSpec(
                num_scalar_prefetch=0,
                grid=grid,
                in_specs=[
                    # Activation tiles stream + double-buffer along the row grid.
                    pl.BlockSpec((tile_p, pack * H_in), lambda i: (i, 0)),
                    # Weight / bias: constant index_map -> fetched once and
                    # VMEM-resident across the whole grid.  Default buffering
                    # kept; Buffered(1) would only save ~128 KiB of VMEM.
                    pl.BlockSpec((pack * H_in, pack * H_out), lambda i: (0, 0)),
                    pl.BlockSpec((1, pack * H_out), lambda i: (0, 0)),
                ],
                out_specs=pl.BlockSpec((tile_p, pack * H_out), lambda i: (i, 0)),
            ),
            compiler_params=pltpu.CompilerParams(
                # Rows independent -> shard row axis across TensorCores on v7x.
                dimension_semantics=("parallel",),
                # Let XLA fuse the activation convert/pad/reshape producers
                # into the pallas input instead of a separate HBM pass.
                allow_input_fusion=[True, False, False],
            ),
            cost_estimate=cost,
        )(xp, wp, bp)

        # Free unpack; slice only the <=3 pack-padding rows (usually a no-op).
        out2d = out_p.reshape(n_packed * pack, H_out)
        if pad_rows:
            out2d = out2d[:N]
        return out2d.reshape((B, T, H_out))

    return forward


if __name__ == "__main__":
    B, T, H_in, H_out = 2, 8, 32, 64

    key = jax.random.PRNGKey(0)
    k_x, k_w, k_b, k_x2 = jax.random.split(key, 4)

    # nn.Linear-style init: U(-1/sqrt(H_in), 1/sqrt(H_in)).
    bound = 1.0 / math.sqrt(H_in)
    weight = jax.random.uniform(k_w, (H_in, H_out), jnp.float32, -bound, bound)
    bias = jax.random.uniform(k_b, (H_out,), jnp.float32, -bound, bound)
    x = jax.random.normal(k_x, (B, T, H_in), jnp.float32)

    # Plain-JAX reference (same semantics as the torch module).
    ref = (x.reshape(B * T, H_in) @ weight + bias).reshape(B, T, H_out)

    # f32 path: strict check.
    fwd = make_time_distributed_linear(weight, bias)
    out = jax.block_until_ready(fwd(x))
    assert out.shape == (B, T, H_out)
    assert jnp.allclose(out, ref, atol=1e-5, rtol=1e-5)

    # bf16 bandwidth path: caller supplies bf16 activations and asks for bf16
    # output (halves both the dominant read and the writeback); f32 accumulate.
    fwd_bf16 = make_time_distributed_linear(
        weight, bias, compute_dtype=jnp.bfloat16, out_dtype=jnp.bfloat16)
    out_bf16 = jax.block_until_ready(fwd_bf16(x.astype(jnp.bfloat16)))
    assert out_bf16.shape == (B, T, H_out)
    assert out_bf16.dtype == jnp.bfloat16
    assert jnp.allclose(out_bf16.astype(jnp.float32), ref, atol=5e-2, rtol=5e-2)

    # Ragged multi-step grid (N=100 rows, small tiles): validates the
    # no-pad / no-slice path with a partial final block.
    B2, T2 = 4, 25
    x2 = jax.random.normal(k_x2, (B2, T2, H_in), jnp.float32)
    ref2 = (x2.reshape(B2 * T2, H_in) @ weight + bias).reshape(B2, T2, H_out)
    fwd_small_tiles = make_time_distributed_linear(weight, bias, row_tile=32)
    out2 = jax.block_until_ready(fwd_small_tiles(x2))
    assert out2.shape == (B2, T2, H_out)
    assert jnp.allclose(out2, ref2, atol=1e-5, rtol=1e-5)

    print("KERNEL_OK")
</pallas_src>

<mosaic_0001>
module attributes {stable_mosaic.version = 11 : i64} {
  func.func @_linear_kernel(%arg0: i32, %arg1: memref<4x128xf32, #tpu.memory_space<vmem>>, %arg2: memref<128x256xf32, #tpu.memory_space<vmem>>, %arg3: memref<1x256xf32, #tpu.memory_space<vmem>>, %arg4: memref<4x256xf32, #tpu.memory_space<vmem>>) attributes {dimension_semantics = [#tpu.dimension_semantics<parallel>], iteration_bounds = array<i64: 1>, scalar_prefetch = 0 : i64, scratch_operands = 0 : i64, tpu.core_type = #tpu.core_type<tc>, window_params = [{transform_indices = @transform_0, window_bounds = array<i64: 4, 128>}, {pipeline_mode = #tpu.pipeline_mode<synchronous>, transform_indices = @transform_1, window_bounds = array<i64: 128, 256>}, {pipeline_mode = #tpu.pipeline_mode<synchronous>, transform_indices = @transform_2, window_bounds = array<i64: 1, 256>}, {transform_indices = @transform_3, window_bounds = array<i64: 4, 256>}]} {
    %c0 = arith.constant 0 : index
    %c0_0 = arith.constant 0 : index
    %0 = vector.load %arg1[%c0, %c0_0] : memref<4x128xf32, #tpu.memory_space<vmem>>, vector<4x128xf32>
    %c0_1 = arith.constant 0 : index
    %c0_2 = arith.constant 0 : index
    %1 = vector.load %arg2[%c0_1, %c0_2] : memref<128x256xf32, #tpu.memory_space<vmem>>, vector<128x256xf32>
    %cst = arith.constant dense<0.000000e+00> : vector<4x256xf32>
    %2 = tpu.matmul %0, %1, %cst {dimension_numbers = #tpu.dot_dimension_numbers<[1], [0], [0], [1], [0, 0, 1, 1], [], []>} : vector<4x128xf32>, vector<128x256xf32>, vector<4x256xf32> -> vector<4x256xf32>
    %c0_3 = arith.constant 0 : index
    %c0_4 = arith.constant 0 : index
    %3 = vector.load %arg3[%c0_3, %c0_4] : memref<1x256xf32, #tpu.memory_space<vmem>>, vector<1x256xf32>
    %4 = vector.broadcast %3 : vector<1x256xf32> to vector<4x256xf32>
    %5 = arith.addf %2, %4 : vector<4x256xf32>
    %c0_5 = arith.constant 0 : index
    %c0_6 = arith.constant 0 : index
    %6 = vector.load %arg4[%c0_5, %c0_6] : memref<4x256xf32, #tpu.memory_space<vmem>>, vector<4x256xf32>
    tpu.vector_store %arg4[%c0_5, %c0_6], %5 {strides = array<i32>} : memref<4x256xf32, #tpu.memory_space<vmem>>, vector<4x256xf32>,
    return
  }
  func.func @transform_0(%arg0: i32) -> (i32, i32) {
    %c0_i32 = arith.constant 0 : i32
    %c0_i32_0 = arith.constant 0 : i32
    return %arg0, %c0_i32 : i32, i32
  }
  func.func @transform_1(%arg0: i32) -> (i32, i32) {
    %c0_i32 = arith.constant 0 : i32
    %c0_i32_0 = arith.constant 0 : i32
    %c0_i32_1 = arith.constant 0 : i32
    return %c0_i32, %c0_i32_0 : i32, i32
  }
  func.func @transform_2(%arg0: i32) -> (i32, i32) {
    %c0_i32 = arith.constant 0 : i32
    %c0_i32_0 = arith.constant 0 : i32
    %c0_i32_1 = arith.constant 0 : i32
    return %c0_i32, %c0_i32_0 : i32, i32
  }
  func.func @transform_3(%arg0: i32) -> (i32, i32) {
    %c0_i32 = arith.constant 0 : i32
    %c0_i32_0 = arith.constant 0 : i32
    return %arg0, %c0_i32 : i32, i32
  }
}

</mosaic_0001>

<bundles_post_ra>
// kernel: forward.1
= control target key start
LH: loop header
LB: loop body
LE: loop exit
PB: predicated region body
PF: predicated region fallthrough
CT: control target
= control target key end

     0   :  { %8 = vsyncpa [#allocation3], 0  ;;  %s150_s15 = smov [#allocation2]   ;;  %s151_s17 = smov 256   ;;  %s185_s0 = inlined_call_operand.vmem [shape: f32[4,128], index: 0, kind: input, shape index: {}]   ;;  %s186_s1 = inlined_call_operand.hbm [shape: f32[128,256], index: 1, kind: input, shape index: {}]   ;;  %s187_s2 = inlined_call_operand.vmem [shape: f32[1,256], index: 2, kind: input, shape index: {}]   ;;  %s188_s3 = inlined_call_operand.vmem [shape: f32[4,256], index: 3, kind: output, shape index: {}]  }
   0x1   :  { %s15_s14 = sshll.u32 %s186_s1, 4  ;;  %s17_s16 = sshll.u32 %s150_s15, 4  ;;  %s16_s14 = int_to_ptr.hbm [resolvable:$true] %s15_s14  ;;  %s18_s16 = int_to_ptr.vmem [resolvable:$true] %s17_s16 }
   0x2   :  { %s152_s18 = smov 16  }
   0x3   :  { %23 = dma.hbm_to_vmem [thread:$0]  %s16_s14, 4096, %s18_s16, [#allocation3], %s151_s17, %s151_s17, %s152_s18  }
   0x4   :  { %148 = dma.done.wait [#allocation3], 4096  }
   0x5   :  { %149 = vsyncadd [#allocation3], 4294963200  ;;  %v62_v0 = vld [vmem:[#allocation2 + $0xf8] sm:$0xff]  ;;  %v61_v1 = vld [vmem:[#allocation2 + $0xf0] sm:$0xff]  ;;  %vm112_vm0 = vcmask 1043456  }
   0x6   :  { %v60_v2 = vld [vmem:[#allocation2 + $0xe8] sm:$0xff]  ;;  %89 = vmatpush.msra.mxu1 %v62_v0  ;;  %69 = vmatpush.msra.mxu0 %v61_v1  ;;  %v59_v3 = vld [vmem:[#allocation2 + $0xe0] sm:$0xff]  ;;  %v58_v4 = vld [vmem:[#allocation2 + $0xd8] sm:$0xff] }
   0x7   :  { %v57_v5 = vld [vmem:[#allocation2 + $0xd0] sm:$0xff]  ;;  %v56_v6 = vld [vmem:[#allocation2 + $0xc8] sm:$0xff]  ;;  %v55_v7 = vld [vmem:[#allocation2 + $0xc0] sm:$0xff] }
   0x8   :  { %90 = vmatpush.msra.mxu1 %v60_v2  ;;  %70 = vmatpush.msra.mxu0 %v59_v3  ;;  %v54_v8 = vld [vmem:[#allocation2 + $0xb8] sm:$0xff]  ;;  %v53_v9 = vld [vmem:[#allocation2 + $0xb0] sm:$0xff]  ;;  %v52_v10 = vld [vmem:[#allocation2 + $0xa8] sm:$0xff] }
   0x9   :  { %v51_v11 = vld [vmem:[#allocation2 + $0xa0] sm:$0xff]  ;;  %v50_v12 = vld [vmem:[#allocation2 + $0x98] sm:$0xff]  ;;  %v49_v13 = vld [vmem:[#allocation2 + $0x90] sm:$0xff] }
   0xa   :  { %91 = vmatpush.msra.mxu1 %v58_v4  ;;  %71 = vmatpush.msra.mxu0 %v57_v5  ;;  %v48_v14 = vld [vmem:[#allocation2 + $0x88] sm:$0xff]  ;;  %v47_v15 = vld [vmem:[#allocation2 + $0x80] sm:$0xff]  ;;  %v46_v16 = vld [vmem:[#allocation2 + $0x78] sm:$0xff] }
   0xb   :  { %v45_v17 = vld [vmem:[#allocation2 + $0x70] sm:$0xff]  ;;  %v44_v18 = vld [vmem:[#allocation2 + $0x68] sm:$0xff]  ;;  %v43_v19 = vld [vmem:[#allocation2 + $0x60] sm:$0xff] }
   0xc   :  { %92 = vmatpush.msra.mxu1 %v56_v6  ;;  %72 = vmatpush.msra.mxu0 %v55_v7  ;;  %v42_v20 = vld [vmem:[#allocation2 + $0x58] sm:$0xff]  ;;  %v41_v21 = vld [vmem:[#allocation2 + $0x50] sm:$0xff]  ;;  %v40_v22 = vld [vmem:[#allocation2 + $0x48] sm:$0xff] }
   0xd   :  { %v39_v23 = vld [vmem:[#allocation2 + $0x40] sm:$0xff]  ;;  %v38_v24 = vld [vmem:[#allocation2 + $0x38] sm:$0xff]  ;;  %v37_v25 = vld [vmem:[#allocation2 + $0x30] sm:$0xff] }
   0xe   :  { %93 = vmatpush.msra.mxu1 %v54_v8  ;;  %73 = vmatpush.msra.mxu0 %v53_v9  ;;  %v36_v26 = vld [vmem:[#allocation2 + $0x28] sm:$0xff]  ;;  %v35_v27 = vld [vmem:[#allocation2 + $0x20] sm:$0xff]  ;;  %v34_v28 = vld [vmem:[#allocation2 + $0x18] sm:$0xff] }
   0xf   :  { %v33_v29 = vld [vmem:[#allocation2 + $0x10] sm:$0xff]  ;;  %v32_v30 = vld [vmem:[#allocation2 + $0x8] sm:$0xff]  ;;  %v31_v31 = vld [vmem:[#allocation2] sm:$0xff] }
  0x10   :  { %94 = vmatpush.msra.mxu1 %v52_v10  ;;  %74 = vmatpush.msra.mxu0 %v51_v11  ;;  %v30_v32 = vld [vmem:[%s185_s0] sm:$0xf] }
  0x11   :  { %v63_v33 = vld [vmem:[%s187_s2] sm:$0x3] }
  0x12   :  { %95 = vmatpush.msra.mxu1 %v50_v12  ;;  %75 = vmatpush.msra.mxu0 %v49_v13  ;;  %v66_v34 = vperm.slane %v63_v33, 1  ;;  %v65_v35 = vperm.slane %v63_v33, 0 }
  0x14   :  { %96 = vmatpush.msra.mxu1 %v48_v14  ;;  %76 = vmatpush.msra.mxu0 %v47_v15 }
  0x16   :  { %97 = vmatpush.msra.mxu1 %v46_v16  ;;  %77 = vmatpush.msra.mxu0 %v45_v17 }
  0x18   :  { %98 = vmatpush.msra.mxu1 %v44_v18  ;;  %78 = vmatpush.msra.mxu0 %v43_v19 }
  0x1a   :  { %99 = vmatpush.msra.mxu1 %v42_v20  ;;  %79 = vmatpush.msra.mxu0 %v41_v21 }
  0x1c   :  { %100 = vmatpush.msra.mxu1 %v40_v22  ;;  %80 = vmatpush.msra.mxu0 %v39_v23 }
  0x1e   :  { %101 = vmatpush.msra.mxu1 %v38_v24  ;;  %81 = vmatpush.msra.mxu0 %v37_v25 }
  0x20   :  { %102 = vmatpush.msra.mxu1 %v36_v26  ;;  %82 = vmatpush.msra.mxu0 %v35_v27 }
  0x22   :  { %103 = vmatpush.msra.mxu1 %v34_v28  ;;  %83 = vmatpush.msra.mxu0 %v33_v29 }
  0x24   :  { %104 = vmatpush.msra.mxu1 %v32_v30  ;;  %84 = vmatpush.msra.mxu0 %v31_v31 }
  0x25   :  { %105 = vmatmul.f32.vlgmr.msra.gmra.mxu1 %v30_v32  ;;  %85 = vmatmul.f32.vlgmr.msra.gmra.mxu0 %v30_v32 }
  0xa2   :  { %v106_v36 = vpop.f32.mrf.mxu1  ;;  %v86_v37 = vpop.f32.mrf.mxu0 }
  0xa3   :  { %v107_v38 = vadd.f32 %v106_v36, %v66_v34  ;;  %v87_v39 = vadd.f32 %v86_v37, %v65_v35 }
  0xa5   :  { %v111_v40 = vrot.slane %v107_v38, 4 }
  0xa7   :  { %v113_v41 = vsel %vm112_vm0, %v87_v39, %v111_v40 }
  0xa8   :  { %115 = vst [vmem:[%s188_s3] sm:$0xff] %v113_v41 }
  0xa9   :  { %120 = vsyncpa [#allocation3], 1 }

</bundles_post_ra>
